<compile_context>
chip_gen: v6e
topology: v6e:2x2x1
jax: 0.10.0
libtpu: 0.0.40
codegen_flags: <defaults>
</compile_context>

<pallas_src>
import jax
import jax.numpy as jnp
from jax.experimental import pallas as pl
from jax.experimental.pallas import tpu as pltpu


def _round_up(x, m):
    return ((x + m - 1) // m) * m


def _vmem_capacity_bytes():
    """Physical VMEM of the current TPU generation; conservative fallback."""
    try:
        info = pltpu.get_tpu_info()
        for attr in ("vmem_capacity_bytes", "vmem_size_bytes", "vmem_bytes"):
            v = getattr(info, attr, None)
            if v:
                return int(v)
    except Exception:
        pass
    return 64 * 1024 * 1024  # v7x per-TensorCore VMEM (smallest of v5e/v6e/v7x)


def _tile_candidates(extent, step, cap):
    """Descending multiples of `step` that divide `extent`, capped at `cap`."""
    cap = min(cap, extent)
    cands = [d for d in range(cap - cap % step, step - 1, -step) if extent % d == 0]
    return cands or [extent]


def _working_set_bytes(tm, tk, tn):
    # double-buffered bf16 x / w tiles + resident f32 out tile (+ writeback
    # copy) + bias row.
    return (2 * tm * tk * 2) + (2 * tk * tn * 2) + (2 * tm * tn * 4) + (2 * tn * 4)


# ---------------------------------------------------------------- kernels ----

def _fc_fused_kernel(x_ref, wt_ref, b_ref, o_ref):
    """Single-block fast path: whole GEMM + bias in one invocation."""
    o_ref[...] = (
        jnp.dot(x_ref[...], wt_ref[...], preferred_element_type=jnp.float32)
        + b_ref[...]
    )


def _fc_tiled_kernel(x_ref, wt_ref, b_ref, o_ref):
    # x_ref: (tm, tk) bf16      wt_ref: (tk, tn) bf16 (BN already folded in)
    # b_ref: (1, tn)  f32       o_ref:  (tm, tn) f32, resident across k axis
    k = pl.program_id(2)

    @pl.when(k == 0)
    def _():
        o_ref[...] = jnp.broadcast_to(b_ref[...], o_ref.shape)

    o_ref[...] += jnp.dot(x_ref[...], wt_ref[...],
                          preferred_element_type=jnp.float32)


# ------------------------------------------------------------- model-load ----

def prepare_params(weight, bias, running_mean, running_var, C, L, eps=1e-5):
    """One-time fold of eval-mode BatchNorm into the Linear layer, plus padding
    and bf16 cast of the weight.  Nothing here runs on the per-call path."""
    out_N, in_N = weight.shape
    assert in_N == C * L

    invstd = 1.0 / jnp.sqrt(running_var.astype(jnp.float32) + eps)        # (C,)
    invstd_vec = jnp.repeat(invstd, L)                                    # (in_N,) feature order c*L + l
    mean_vec = jnp.repeat(running_mean.astype(jnp.float32), L)            # (in_N,)

    wt_f32 = weight.T.astype(jnp.float32) * invstd_vec[:, None]           # (in_N, out_N)
    b_fold = bias.astype(jnp.float32) - (mean_vec * invstd_vec) @ weight.T.astype(jnp.float32)

    Kp = _round_up(in_N, 128)
    Np = _round_up(out_N, 128)
    wt_pad = jnp.pad(wt_f32, ((0, Kp - in_N), (0, Np - out_N))).astype(jnp.bfloat16)
    b_pad = jnp.pad(b_fold.reshape(1, out_N), ((0, 0), (0, Np - out_N)))  # f32

    return dict(wt=wt_pad, b=b_pad, in_N=in_N, out_N=out_N, Kp=Kp, Np=Np)


# ---------------------------------------------------------------- forward ----

def net_forward(x, params):
    """x: (B, C, L) f32.  Returns (B, out_N) f32 (eval-mode forward)."""
    wt_pad, b_pad = params["wt"], params["b"]
    in_N, out_N = params["in_N"], params["out_N"]
    Kp, Np = params["Kp"], params["Np"]
    B, C, L = x.shape
    assert C * L == in_N

    # TODO(synk): dropout is identity in eval mode; training-mode mask not implemented.
    Bp = _round_up(B, 16)  # bf16 packs 16 rows per sublane group
    x_pad = jnp.pad(x.reshape(B, in_N).astype(jnp.float32),
                    ((0, Bp - B), (0, Kp - in_N))).astype(jnp.bfloat16)

    vmem_phys = _vmem_capacity_bytes()

    # ---- single-block fast path for small layers ----
    single_ws = Bp * Kp * 2 + Kp * Np * 2 + Np * 4 + Bp * Np * 4
    if single_ws <= min(4 * 1024 * 1024, vmem_phys // 8):
        out_pad = pl.pallas_call(
            _fc_fused_kernel,
            out_shape=jax.ShapeDtypeStruct((Bp, Np), jnp.float32),
        )(x_pad, wt_pad, b_pad)
        return out_pad[:B, :out_N]

    # ---- tiled path: pick tiles that divide the padded extents & fit VMEM ----
    budget = int(vmem_phys * 0.45)
    tm_c = _tile_candidates(Bp, 16, 512)
    tk_c = _tile_candidates(Kp, 128, 1024)
    tn_c = _tile_candidates(Np, 128, 1024)
    im = ik = jn = 0
    tm, tk, tn = tm_c[0], tk_c[0], tn_c[0]
    while _working_set_bytes(tm, tk, tn) > budget:
        opts = []
        if ik + 1 < len(tk_c):
            opts.append(("k", tk))
        if jn + 1 < len(tn_c):
            opts.append(("n", tn))
        if im + 1 < len(tm_c):
            opts.append(("m", tm))
        if not opts:
            break
        ax = max(opts, key=lambda t: t[1])[0]
        if ax == "k":
            ik += 1
            tk = tk_c[ik]
        elif ax == "n":
            jn += 1
            tn = tn_c[jn]
        else:
            im += 1
            tm = tm_c[im]

    # Guarantee >=2 parallel grid steps so both TensorCores get work (v7x).
    if (Bp // tm) * (Np // tn) == 1:
        tn_split = [c for c in tn_c if Np // c >= 2]
        tm_split = [c for c in tm_c if Bp // c >= 2]
        if tn_split:
            tn = tn_split[0]
        elif tm_split:
            tm = tm_split[0]

    grid = (Bp // tm, Np // tn, Kp // tk)

    cost = pl.CostEstimate(
        flops=2 * Bp * Kp * Np,
        transcendentals=0,
        bytes_accessed=Bp * Kp * 2 + (Bp // tm) * Kp * Np * 2 + Np * 4 + Bp * Np * 4,
    )

    out_pad = pl.pallas_call(
        _fc_tiled_kernel,
        out_shape=jax.ShapeDtypeStruct((Bp, Np), jnp.float32),
        grid_spec=pltpu.PrefetchScalarGridSpec(
            num_scalar_prefetch=0,
            grid=grid,
            in_specs=[
                pl.BlockSpec((tm, tk), lambda i, j, k: (i, k)),
                pl.BlockSpec((tk, tn), lambda i, j, k: (k, j)),
                pl.BlockSpec((1, tn), lambda i, j, k: (0, j)),
            ],
            out_specs=pl.BlockSpec((tm, tn), lambda i, j, k: (i, j)),
        ),
        compiler_params=pltpu.CompilerParams(
            dimension_semantics=("parallel", "parallel", "arbitrary"),
            vmem_limit_bytes=int(vmem_phys * 0.75),
        ),
        cost_estimate=cost,
    )(x_pad, wt_pad, b_pad)

    return out_pad[:B, :out_N]


# ------------------------------------------------------------------- init ----

def init_params(key, in_N, out_N):
    """Deterministic init matching Net.__init__ (uniform(-scale, scale), zero bias)."""
    scale = jnp.sqrt(2.0 / (in_N + out_N))
    weight = jax.random.uniform(key, (out_N, in_N), jnp.float32,
                                minval=-scale, maxval=scale)
    bias = jnp.zeros((out_N,), jnp.float32)
    return weight, bias


if __name__ == "__main__":
    eps = 1e-5

    def reference(x, weight, bias, mean, var):
        xn = (x - mean[None, :, None]) / jnp.sqrt(var[None, :, None] + eps)
        return xn.reshape(x.shape[0], -1) @ weight.T + bias

    key = jax.random.PRNGKey(0)

    # ---- case 1: tiny layer implied by the module (fast single-block path) ----
    B, C, L = 2, 3, 8
    in_N, out_N = C * L, 32
    k1, k2, key = jax.random.split(key, 3)
    x = jax.random.normal(k1, (B, C, L), jnp.float32)
    weight, bias = init_params(k2, in_N, out_N)
    running_mean = jnp.array([0.10, -0.20, 0.05], jnp.float32)   # BatchNorm1d(3) buffers
    running_var = jnp.array([1.50, 0.80, 1.20], jnp.float32)
    params = prepare_params(weight, bias, running_mean, running_var, C, L, eps)

    out = jax.block_until_ready(net_forward(x, params))
    ref = reference(x, weight, bias, running_mean, running_var)
    assert out.shape == (B, out_N)
    assert jnp.allclose(out, ref, atol=5e-2, rtol=5e-2), float(jnp.max(jnp.abs(out - ref)))

    # ---- case 2: larger layer to exercise the tiled multi-block path ----
    B2, C2, L2 = 256, 3, 700
    in_N2, out_N2 = C2 * L2, 2048
    k3, k4, key = jax.random.split(key, 3)
    x2 = jax.random.normal(k3, (B2, C2, L2), jnp.float32)
    weight2, bias2 = init_params(k4, in_N2, out_N2)
    running_mean2 = jnp.array([0.30, -0.10, 0.20], jnp.float32)
    running_var2 = jnp.array([0.90, 1.40, 1.10], jnp.float32)
    params2 = prepare_params(weight2, bias2, running_mean2, running_var2, C2, L2, eps)

    out2 = jax.block_until_ready(net_forward(x2, params2))
    ref2 = reference(x2, weight2, bias2, running_mean2, running_var2)
    assert out2.shape == (B2, out_N2)
    assert jnp.allclose(out2, ref2, atol=1e-1, rtol=5e-2), float(jnp.max(jnp.abs(out2 - ref2)))

    print("KERNEL_OK")
</pallas_src>

<mosaic_0001>
module attributes {stable_mosaic.version = 11 : i64} {
  func.func @_fc_fused_kernel(%arg0: memref<16x128xbf16, #tpu.memory_space<vmem>>, %arg1: memref<128x128xbf16, #tpu.memory_space<vmem>>, %arg2: memref<1x128xf32, #tpu.memory_space<vmem>>, %arg3: memref<16x128xf32, #tpu.memory_space<vmem>>) attributes {dimension_semantics = [], scalar_prefetch = 0 : i64, scratch_operands = 0 : i64, tpu.core_type = #tpu.core_type<tc>} {
    %c0 = arith.constant 0 : index
    %c0_0 = arith.constant 0 : index
    %0 = vector.load %arg0[%c0, %c0_0] : memref<16x128xbf16, #tpu.memory_space<vmem>>, vector<16x128xbf16>
    %c0_1 = arith.constant 0 : index
    %c0_2 = arith.constant 0 : index
    %1 = vector.load %arg1[%c0_1, %c0_2] : memref<128x128xbf16, #tpu.memory_space<vmem>>, vector<128x128xbf16>
    %cst = arith.constant dense<0.000000e+00> : vector<16x128xf32>
    %2 = tpu.matmul %0, %1, %cst {dimension_numbers = #tpu.dot_dimension_numbers<[1], [0], [0], [1], [0, 0, 1, 1], [], []>} : vector<16x128xbf16>, vector<128x128xbf16>, vector<16x128xf32> -> vector<16x128xf32>
    %c0_3 = arith.constant 0 : index
    %c0_4 = arith.constant 0 : index
    %3 = vector.load %arg2[%c0_3, %c0_4] : memref<1x128xf32, #tpu.memory_space<vmem>>, vector<1x128xf32>
    %4 = vector.broadcast %3 : vector<1x128xf32> to vector<16x128xf32>
    %5 = arith.addf %2, %4 : vector<16x128xf32>
    %c0_5 = arith.constant 0 : index
    %c0_6 = arith.constant 0 : index
    %6 = vector.load %arg3[%c0_5, %c0_6] : memref<16x128xf32, #tpu.memory_space<vmem>>, vector<16x128xf32>
    tpu.vector_store %arg3[%c0_5, %c0_6], %5 {strides = array<i32>} : memref<16x128xf32, #tpu.memory_space<vmem>>, vector<16x128xf32>,
    return
  }
}

</mosaic_0001>

<bundles_post_ra>
// kernel: tpu_custom_call.1
= control target key start
LH: loop header
LB: loop body
LE: loop exit
PB: predicated region body
PF: predicated region fallthrough
CT: control target
= control target key end

     0   :  { %8 = vsyncpa [#allocation3], 0  ;;  %s348_s0 = inlined_call_operand.hbm [shape: bf16[16,128], index: 0, kind: input, shape index: {}]   ;;  %s349_s1 = inlined_call_operand.hbm [shape: bf16[128,128], index: 1, kind: input, shape index: {}]   ;;  %s350_s2 = inlined_call_operand.vmem [shape: f32[1,128], index: 2, kind: input, shape index: {}]   ;;  %s351_s3 = inlined_call_operand.hbm [shape: f32[16,128], index: 3, kind: output, shape index: {}]  }
   0x1   :  { %9 = vsyncpa [#allocation6], 0 }
   0x2   :  { %10 = vsyncpa [#allocation4], 0  ;;  %s307_s12 = smov [#allocation2]  }
   0x3   :  { %s16_s13 = sshll.u32 %s307_s12, 4  ;;  %s17_s13 = int_to_ptr.vmem [resolvable:$true] %s16_s13 }
   0x4   :  { %s249_s14 = scalar_lea.vmem %s17_s13, 128  ;;  %p254_p1 = scmp.lt.s32.totalorder %s17_s13, %s17_s13 }
   0x5   :  { %p250_p0 = scmp.ne.s32.totalorder %s17_s13, %s249_s14  ;;  %p255_p2 = scmp.lt.s32.totalorder %s249_s14, %s249_s14 }
   0x7   :  { %p256_p3 = por %p255_p2, %p254_p1 }
   0x9   :  { %p257_p4 = pnand %p256_p3, %p250_p0 }
   0xb   :  { %260 = shalt.err (!%p257_p4)
}
   0xc   :  { %s308_s15 = smov 64   ;;  %s309_s16 = smov 4  }
   0xd   :  { %22 = dma.hbm_to_vmem [thread:$0]  %s348_s0, 128, %s17_s13, [#allocation3], %s308_s15, %s308_s15, %s309_s16  }
   0xe   :  { %s310_s19 = smov [#allocation5]  }
   0xf   :  { %s28_s20 = sshll.u32 %s310_s19, 4  ;;  %s29_s20 = int_to_ptr.vmem [resolvable:$true] %s28_s20 }
  0x10   :  { %s269_s21 = scalar_lea.vmem %s29_s20, 1024  ;;  %p274_p6 = scmp.lt.s32.totalorder %s29_s20, %s29_s20 }
  0x11   :  { %p270_p5 = scmp.ne.s32.totalorder %s29_s20, %s269_s21  ;;  %p275_p7 = scmp.lt.s32.totalorder %s269_s21, %s269_s21 }
  0x13   :  { %p276_p8 = por %p275_p7, %p274_p6 }
  0x15   :  { %p277_p9 = pnand %p276_p8, %p270_p5 }
  0x17   :  { %280 = shalt.err (!%p277_p9)
}
  0x18   :  { %34 = dma.hbm_to_vmem [thread:$0]  %s349_s1, 1024, %s29_s20, [#allocation6], %s308_s15, %s308_s15, %s309_s16  }
  0x19   :  { %301 = dma.done.wait [#allocation3], 128  }
  0x1a   :  { %302 = vsyncadd [#allocation3], 4294967168 }
  0x1b   :  { %303 = dma.done.wait [#allocation6], 1024  }
  0x1c   :  { %304 = vsyncadd [#allocation6], 4294966272  ;;  %v311_v0 = vmov 0.0   ;;  %vm312_vm0 = vmmov 0   ;;  %v232_v1 = vld [vmem:[#allocation5 + $0x38] sm:$0xff]   ;;  %v233_v2 = vld [vmem:[#allocation5 + $0x30] sm:$0xff]  }
  0x1d   :  { %203 = vmatprep.subr.bf16.mxu0 %v311_v0  ;;  %219 = vmatprep.mubr.msk.bf16.mxu0 %vm312_vm0, %v311_v0  ;;  %v234_v3 = vld [vmem:[#allocation5 + $0x28] sm:$0xff]   ;;  %v235_v4 = vld [vmem:[#allocation5 + $0x20] sm:$0xff]   ;;  %v236_v5 = vld [vmem:[#allocation5 + $0x18] sm:$0xff]   ;;  %s313_s24 = smov [#allocation7]  }
  0x1e   :  { %204 = vmatpush3.bf16.msra.mxu0 %v232_v1  ;;  %v237_v6 = vld [vmem:[#allocation5 + $0x10] sm:$0xff]   ;;  %v238_v7 = vld [vmem:[#allocation5 + $0x8] sm:$0xff]   ;;  %v239_v8 = vld [vmem:[#allocation5] sm:$0xff]   ;;  %s171_s25 = sshll.u32 %s313_s24, 4  ;;  %s172_s25 = int_to_ptr.vmem [resolvable:$true] %s171_s25 }
  0x1f   :  { %205 = vmatprep.subr.bf16.mxu0 %v311_v0  ;;  %v240_v9 = vld [vmem:[#allocation2] sm:$0xff]   ;;  %s281_s26 = scalar_lea.vmem %s172_s25, 256  ;;  %p286_p11 = scmp.lt.s32.totalorder %s172_s25, %s172_s25 }
  0x20   :  { %v184_v10 = vld [vmem:[%s350_s2] ss:$0 sm:$0xff]  ;;  %p282_p10 = scmp.ne.s32.totalorder %s172_s25, %s281_s26  ;;  %p287_p12 = scmp.lt.s32.totalorder %s281_s26, %s281_s26 }
  0x22   :  { %206 = vmatpush3.bf16.msra.mxu0 %v233_v2  ;;  %p288_p13 = por %p287_p12, %p286_p11 }
  0x23   :  { %207 = vmatprep.subr.bf16.mxu0 %v311_v0 }
  0x24   :  { %p289_p0 = pnand %p288_p13, %p282_p10 }
  0x26   :  { %208 = vmatpush3.bf16.msra.mxu0 %v234_v3 }
  0x27   :  { %209 = vmatprep.subr.bf16.mxu0 %v311_v0 }
  0x2a   :  { %210 = vmatpush3.bf16.msra.mxu0 %v235_v4 }
  0x2b   :  { %211 = vmatprep.subr.bf16.mxu0 %v311_v0 }
  0x2e   :  { %212 = vmatpush3.bf16.msra.mxu0 %v236_v5 }
  0x2f   :  { %213 = vmatprep.subr.bf16.mxu0 %v311_v0 }
  0x32   :  { %214 = vmatpush3.bf16.msra.mxu0 %v237_v6 }
  0x33   :  { %215 = vmatprep.subr.bf16.mxu0 %v311_v0 }
  0x36   :  { %216 = vmatpush3.bf16.msra.mxu0 %v238_v7 }
  0x37   :  { %217 = vmatprep.subr.bf16.mxu0 %v311_v0 }
  0x3a   :  { %218 = vmatpush3.bf16.msra.mxu0 %v239_v8 }
  0x3d   :  { %220 = vmatmul.mubr.bf16.vlgmr.msra.gmra.mxu0 %v240_v9 }
  0xfd   :  { %v157_v11 = vpop.f32.mrf.mxu0 }
  0xfe   :  { %v158_v12 = vadd.f32 %v184_v10, %v157_v11 }
  0xff   :  { %v221_v13 = vpop.f32.mrf.mxu0 }
 0x100   :  { %164 = vst [vmem:[#allocation7] sm:$0xff] %v158_v12 }
 0x101   :  { %v160_v14 = vpop.f32.mrf.mxu0 }
 0x102   :  { %v161_v15 = vadd.f32 %v184_v10, %v160_v14 }
 0x103   :  { %v222_v16 = vpop.f32.mrf.mxu0 }
 0x104   :  { %165 = vst [vmem:[#allocation7 + $0x8] sm:$0xff] %v161_v15 }
 0x105   :  { %292 = shalt.err (!%p289_p0)
}
 0x106   :  { %s314_s27 = smov 128   ;;  %s315_s2 = smov 8  }
 0x107   :  { %177 = dma.vmem_to_hbm [thread:$0]  %s172_s25, 256, %s351_s3, [#allocation4], %s314_s27, %s314_s27, %s315_s2  }
 0x108   :  { %305 = dma.done.wait [#allocation4], 256  }
 0x109   :  { %306 = vsyncadd [#allocation4], 4294967040 }
 0x10a   :  { %181 = vsyncpa [#allocation3], 1 }
 0x10b   :  { %182 = vsyncpa [#allocation6], 1 }
 0x10c   :  { %183 = vsyncpa [#allocation4], 1 }

</bundles_post_ra>
